<compile_context>
chip_gen: v6e
topology: v6e:2x2x1
jax: 0.10.0
libtpu: 0.0.40
codegen_flags: <defaults>
</compile_context>

<pallas_src>
import functools

import jax
import jax.numpy as jnp
from jax.experimental import pallas as pl
from jax.experimental.pallas import tpu as pltpu


# ----------------------------- packed-parameter layout -----------------------------
# Weight slab W (compute dtype, f32 or bf16), shape (272, 128):
#   rows   0:128  W2^T padded:  W[i, j] = fc2.weight-as-(in,out)[j, i]  (i, j < 50)
#   rows 128:256  W1^T padded:  W[128+j, f] = fc1.weight-as-(in,out)[f, j]  (lanes 0:16)
#   rows 256:272  fc3 block:    row 256, lanes 0:50 = fc3 weight column; rest zero
# Bias slab B (always f32), shape (128, 8):
#   lane 0 rows 0:50 = b1 ; lane 1 rows 0:50 = b2 ; [0, 2] = b3 ; rest zero
_SLAB_ROWS = 272
_LANES = 128
_BIAS_ROWS = 128
_BIAS_COLS = 8


def pack_params(params, dtype=jnp.bfloat16):
    """Pack (w1, b1, w2, b2, w3, b3) into (weight_slab[dtype], bias_slab[f32])."""
    w1, b1, w2, b2, w3, b3 = params          # (16,50),(50,),(50,50),(50,),(50,1),(1,)
    slab = jnp.zeros((_SLAB_ROWS, _LANES), jnp.float32)
    slab = slab.at[0:50, 0:50].set(w2.T)                 # W2^T
    slab = slab.at[128:178, 0:16].set(w1.T)              # W1^T  (50, 16)
    slab = slab.at[256, 0:50].set(w3[:, 0])              # fc3 weights as a row
    bias = jnp.zeros((_BIAS_ROWS, _BIAS_COLS), jnp.float32)
    bias = bias.at[0:50, 0].set(b1)
    bias = bias.at[0:50, 1].set(b2)
    bias = bias.at[0, 2].set(b3[0])                      # b3 stays exact f32
    return slab.astype(dtype), bias


# ----------------------------------- kernel ----------------------------------------
def _mlp_kernel(x_ref, w_ref, b_ref, o_ref):
    cd = w_ref.dtype                          # MXU input dtype (f32 or bf16)
    x = x_ref[...].astype(cd)                 # (TB, 16); cast in VMEM, no HBM pass

    w2T = w_ref[0:128, :]                     # (128, 128)
    w1T = w_ref[128:256, 0:16]                # (128, 16)
    w3T = w_ref[256:272, :]                   # (16, 128); row 0 is the real fc3 row

    b = b_ref[...]                            # (128, 8) f32
    b1c = b[:, 0:1]                           # (128, 1) broadcast along lanes
    b2c = b[:, 1:2]
    b3 = b[0:1, 2:3]                          # (1, 1) exact-f32 output bias

    # fc1 in transposed orientation (hidden on sublanes, batch on lanes).
    # Only the (TB,16) x operand needs a relayout for the contraction — 8x less
    # XLU traffic than transposing the (TB,128) hidden activations.
    h1 = jnp.einsum('hf,bf->hb', w1T, x, preferred_element_type=jnp.float32)
    h1 = jnp.maximum(h1 + b1c, 0.0).astype(cd)            # (128, TB)

    # fc2: canonical MXU matmul, no relayouts.
    h2 = jnp.dot(w2T, h1, preferred_element_type=jnp.float32)
    h2 = jnp.maximum(h2 + b2c, 0.0).astype(cd)            # (128, TB)

    # fc3: canonical MXU matmul producing a lane-dense row directly; rows 1:16 of
    # the lhs block are zero and are simply discarded.
    o16 = jnp.dot(w3T, h2, preferred_element_type=jnp.float32)   # (16, TB)
    o_ref[...] = (o16[0:1, :] + b3).astype(o_ref.dtype)          # (1, TB) unmasked lanes


# ---------------------------------- wrapper -----------------------------------------
def _round_up(n, m):
    return ((n + m - 1) // m) * m


def _choose_tb(B, block_rows):
    """Batch tile: multiple of 128, capped by block_rows, and >=2 grid steps when
    the batch allows it (v7x megacore sharding + DMA/compute overlap everywhere)."""
    tb = min(block_rows, _round_up(B, 128))
    if B > 128 and pl.cdiv(B, tb) < 2:
        tb = min(block_rows, max(128, _round_up(pl.cdiv(B, 2), 128)))
    return tb


@functools.partial(jax.jit, static_argnames=("block_rows",))
def small_ff_forward(x_tuple, wslab, bias, *, block_rows=4096):
    """Mirrors SmallFF.forward: takes (x, _) tuple, returns shape (B,)."""
    x, _ = x_tuple
    B, F = x.shape
    assert F == 16, F

    tb = _choose_tb(B, block_rows)
    grid = pl.cdiv(B, tb)     # ragged B handled by Pallas partial blocks (no jnp.pad)

    out = pl.pallas_call(
        _mlp_kernel,
        out_shape=jax.ShapeDtypeStruct((1, B), jnp.float32),
        grid_spec=pltpu.PrefetchScalarGridSpec(
            num_scalar_prefetch=0,
            grid=(grid,),
            in_specs=[
                # x: streamed batch tiles, double-buffered by the pipeline.
                pl.BlockSpec((tb, 16), lambda i: (i, 0)),
                # packed weights / biases: constant block index -> DMA'd once,
                # VMEM-resident across all grid steps.
                # (Optional knob: pipeline_mode=pl.Buffered(1) to drop the dead
                #  second buffer; skipped here — ~0.1 MiB, not worth risk.)
                pl.BlockSpec((_SLAB_ROWS, _LANES), lambda i: (0, 0)),
                pl.BlockSpec((_BIAS_ROWS, _BIAS_COLS), lambda i: (0, 0)),
            ],
            # Lane-dense output blocks: last dim is tb (multiple of 128).
            out_specs=pl.BlockSpec((1, tb), lambda i: (0, i)),
        ),
        compiler_params=pltpu.CompilerParams(
            dimension_semantics=("parallel",),      # shard batch tiles across v7x TCs
            vmem_limit_bytes=32 * 1024 * 1024,      # raise v5e's 16 MiB scoped default
        ),
    )(x, wslab, bias)

    return out[0]                                   # matches x.squeeze(-1) in PyTorch


# -------------------------- init + pure-JAX reference -------------------------------
def init_params(key):
    """Deterministic init matching nn.Linear shapes (weights stored as (in, out))."""
    dims = [(16, 50), (50, 50), (50, 1)]
    params = []
    for i, (fan_in, fan_out) in enumerate(dims):
        kw, kb = jax.random.split(jax.random.fold_in(key, i))
        bound = 1.0 / jnp.sqrt(fan_in)
        w = jax.random.uniform(kw, (fan_in, fan_out), jnp.float32, -bound, bound)
        b = jax.random.uniform(kb, (fan_out,), jnp.float32, -bound, bound)
        params += [w, b]
    return tuple(params)


def reference_forward(x_tuple, params):
    x, _ = x_tuple
    w1, b1, w2, b2, w3, b3 = params
    h1 = jnp.maximum(x @ w1 + b1, 0.0)
    h2 = jnp.maximum(h1 @ w2 + b2, 0.0)
    return (h2 @ w3 + b3).squeeze(-1)


if __name__ == "__main__":
    key = jax.random.PRNGKey(0)
    k_x, k_p, k_d = jax.random.split(key, 3)

    B = 8
    x = jax.random.normal(k_x, (B, 16), jnp.float32)
    dummy = jax.random.normal(k_d, (B,), jnp.float32)   # second tuple element is ignored
    params = init_params(k_p)
    y_ref = reference_forward((x, dummy), params)

    # f32 weight path: matches the PyTorch module's numerics.
    wslab32, bias32 = pack_params(params, jnp.float32)
    y32 = jax.block_until_ready(small_ff_forward((x, dummy), wslab32, bias32))
    assert y32.shape == (B,), y32.shape
    assert jnp.allclose(y32, y_ref, atol=1e-5, rtol=1e-5), (y32, y_ref)

    # Default bf16 weight path (f32 accumulation + f32 biases); x may be f32 or bf16.
    wslab16, bias16 = pack_params(params)
    y16 = jax.block_until_ready(small_ff_forward((x, dummy), wslab16, bias16))
    assert y16.shape == (B,), y16.shape
    assert jnp.allclose(y16, y_ref, atol=1e-1, rtol=1e-1), (y16, y_ref)

    # Ragged, larger batch: exercises the multi-step grid and the partial last tile
    # (no wrapper-side padding pass over x).
    B2 = 1000
    x2 = jax.random.normal(k_x, (B2, 16), jnp.float32)
    d2 = jnp.zeros((B2,), jnp.float32)
    y2 = jax.block_until_ready(small_ff_forward((x2, d2), wslab32, bias32))
    y2_ref = reference_forward((x2, d2), params)
    assert y2.shape == (B2,), y2.shape
    assert jnp.allclose(y2, y2_ref, atol=1e-4, rtol=1e-4)

    print("KERNEL_OK")
</pallas_src>

<mosaic_0001>
module attributes {stable_mosaic.version = 11 : i64} {
  func.func @_mlp_kernel(%arg0: i32, %arg1: memref<128x16xf32, #tpu.memory_space<vmem>>, %arg2: memref<272x128xf32, #tpu.memory_space<vmem>>, %arg3: memref<128x8xf32, #tpu.memory_space<vmem>>, %arg4: memref<1x128xf32, #tpu.memory_space<vmem>>) attributes {dimension_semantics = [#tpu.dimension_semantics<parallel>], iteration_bounds = array<i64: 1>, scalar_prefetch = 0 : i64, scratch_operands = 0 : i64, tpu.core_type = #tpu.core_type<tc>, window_params = [{transform_indices = @transform_0, window_bounds = array<i64: 128, 16>}, {pipeline_mode = #tpu.pipeline_mode<synchronous>, transform_indices = @transform_1, window_bounds = array<i64: 272, 128>}, {pipeline_mode = #tpu.pipeline_mode<synchronous>, transform_indices = @transform_2, window_bounds = array<i64: 128, 8>}, {transform_indices = @transform_3, window_bounds = array<i64: 1, 128>}]} {
    %c0 = arith.constant 0 : index
    %c0_0 = arith.constant 0 : index
    %0 = vector.load %arg1[%c0, %c0_0] : memref<128x16xf32, #tpu.memory_space<vmem>>, vector<128x16xf32>
    %c0_1 = arith.constant 0 : index
    %c0_2 = arith.constant 0 : index
    %1 = vector.load %arg2[%c0_1, %c0_2] : memref<272x128xf32, #tpu.memory_space<vmem>>, vector<128x128xf32>
    %c128 = arith.constant 128 : index
    %c0_3 = arith.constant 0 : index
    %2 = vector.load %arg2[%c128, %c0_3] : memref<272x128xf32, #tpu.memory_space<vmem>>, vector<128x16xf32>
    %c256 = arith.constant 256 : index
    %c0_4 = arith.constant 0 : index
    %3 = vector.load %arg2[%c256, %c0_4] : memref<272x128xf32, #tpu.memory_space<vmem>>, vector<16x128xf32>
    %c0_5 = arith.constant 0 : index
    %c0_6 = arith.constant 0 : index
    %4 = vector.load %arg3[%c0_5, %c0_6] : memref<128x8xf32, #tpu.memory_space<vmem>>, vector<128x8xf32>
    %5 = vector.extract_strided_slice %4 {offsets = [0, 0], sizes = [128, 1], strides = [1, 1]} : vector<128x8xf32> to vector<128x1xf32>
    %6 = vector.extract_strided_slice %4 {offsets = [0, 1], sizes = [128, 1], strides = [1, 1]} : vector<128x8xf32> to vector<128x1xf32>
    %7 = vector.extract_strided_slice %4 {offsets = [0, 2], sizes = [1, 1], strides = [1, 1]} : vector<128x8xf32> to vector<1x1xf32>
    "tpu.trace_start"() <{level = 10 : i32, message = "hf,bf->hb"}> : () -> ()
    %cst = arith.constant dense<0.000000e+00> : vector<128x128xf32>
    %8 = tpu.matmul %2, %0, %cst {dimension_numbers = #tpu.dot_dimension_numbers<[1], [1], [0], [0], [0, 0, 1, 0], [], []>} : vector<128x16xf32>, vector<128x16xf32>, vector<128x128xf32> -> vector<128x128xf32>
    "tpu.trace_stop"() : () -> ()
    %9 = vector.broadcast %5 : vector<128x1xf32> to vector<128x128xf32>
    %10 = arith.addf %8, %9 : vector<128x128xf32>
    %cst_7 = arith.constant 0.000000e+00 : f32
    %11 = vector.broadcast %cst_7 : f32 to vector<128x128xf32>
    %12 = arith.maximumf %10, %11 : vector<128x128xf32>
    %cst_8 = arith.constant dense<0.000000e+00> : vector<128x128xf32>
    %13 = tpu.matmul %1, %12, %cst_8 {dimension_numbers = #tpu.dot_dimension_numbers<[1], [0], [0], [1], [0, 0, 1, 1], [], []>} : vector<128x128xf32>, vector<128x128xf32>, vector<128x128xf32> -> vector<128x128xf32>
    %14 = vector.broadcast %6 : vector<128x1xf32> to vector<128x128xf32>
    %15 = arith.addf %13, %14 : vector<128x128xf32>
    %cst_9 = arith.constant 0.000000e+00 : f32
    %16 = vector.broadcast %cst_9 : f32 to vector<128x128xf32>
    %17 = arith.maximumf %15, %16 : vector<128x128xf32>
    %cst_10 = arith.constant dense<0.000000e+00> : vector<16x128xf32>
    %18 = tpu.matmul %3, %17, %cst_10 {dimension_numbers = #tpu.dot_dimension_numbers<[1], [0], [0], [1], [0, 0, 1, 1], [], []>} : vector<16x128xf32>, vector<128x128xf32>, vector<16x128xf32> -> vector<16x128xf32>
    %19 = vector.extract_strided_slice %18 {offsets = [0, 0], sizes = [1, 128], strides = [1, 1]} : vector<16x128xf32> to vector<1x128xf32>
    %20 = vector.broadcast %7 : vector<1x1xf32> to vector<1x128xf32>
    %21 = arith.addf %19, %20 : vector<1x128xf32>
    %c0_11 = arith.constant 0 : index
    %c0_12 = arith.constant 0 : index
    %22 = vector.load %arg4[%c0_11, %c0_12] : memref<1x128xf32, #tpu.memory_space<vmem>>, vector<1x128xf32>
    tpu.vector_store %arg4[%c0_11, %c0_12], %21 {strides = array<i32>} : memref<1x128xf32, #tpu.memory_space<vmem>>, vector<1x128xf32>,
    return
  }
  func.func @transform_0(%arg0: i32) -> (i32, i32) {
    %c0_i32 = arith.constant 0 : i32
    %c0_i32_0 = arith.constant 0 : i32
    return %arg0, %c0_i32 : i32, i32
  }
  func.func @transform_1(%arg0: i32) -> (i32, i32) {
    %c0_i32 = arith.constant 0 : i32
    %c0_i32_0 = arith.constant 0 : i32
    %c0_i32_1 = arith.constant 0 : i32
    return %c0_i32, %c0_i32_0 : i32, i32
  }
  func.func @transform_2(%arg0: i32) -> (i32, i32) {
    %c0_i32 = arith.constant 0 : i32
    %c0_i32_0 = arith.constant 0 : i32
    %c0_i32_1 = arith.constant 0 : i32
    return %c0_i32, %c0_i32_0 : i32, i32
  }
  func.func @transform_3(%arg0: i32) -> (i32, i32) {
    %c0_i32 = arith.constant 0 : i32
    %c0_i32_0 = arith.constant 0 : i32
    return %c0_i32, %arg0 : i32, i32
  }
}

</mosaic_0001>

<bundles_post_ra>
// kernel: small_ff_forward.1
= control target key start
LH: loop header
LB: loop body
LE: loop exit
PB: predicated region body
PF: predicated region fallthrough
CT: control target
= control target key end

     0   :  { %8 = vsyncpa [#allocation3], 0  ;;  %s1337_s0 = inlined_call_operand.vmem [shape: f32[8,16], index: 0, kind: input, shape index: {}]   ;;  %s1338_s1 = inlined_call_operand.hbm [shape: f32[272,128], index: 1, kind: input, shape index: {}]   ;;  %s1339_s2 = inlined_call_operand.vmem [shape: f32[128,8], index: 2, kind: input, shape index: {}]   ;;  %s1340_s3 = inlined_call_operand.hbm [shape: f32[1,8], index: 3, kind: output, shape index: {}]  }
   0x1   :  { %9 = vsyncpa [#allocation4], 0  ;;  %s1071_s12 = smov [#allocation2]  }
   0x2   :  { %s17_s13 = sshll.u32 %s1071_s12, 4  ;;  %s18_s13 = int_to_ptr.vmem [resolvable:$true] %s17_s13 }
   0x3   :  { %s1035_s14 = scalar_lea.vmem %s18_s13, 4352  ;;  %p1040_p1 = scmp.lt.s32.totalorder %s18_s13, %s18_s13 }
   0x4   :  { %p1036_p0 = scmp.ne.s32.totalorder %s18_s13, %s1035_s14  ;;  %p1041_p2 = scmp.lt.s32.totalorder %s1035_s14, %s1035_s14 }
   0x6   :  { %p1042_p3 = por %p1041_p2, %p1040_p1 }
   0x8   :  { %p1043_p4 = pnand %p1042_p3, %p1036_p0 }
   0xa   :  { %1046 = shalt.err (!%p1043_p4)
}
   0xb   :  { %s1072_s15 = smov 128   ;;  %s1073_s16 = smov 8  }
   0xc   :  { %23 = dma.hbm_to_vmem [thread:$0]  %s1338_s1, 4352, %s18_s13, [#allocation3], %s1072_s15, %s1072_s15, %s1073_s16  }
   0xd   :  { %1067 = dma.done.wait [#allocation3], 4352  }
   0xe   :  { %1068 = vsyncadd [#allocation3], 4294962944  ;;  %v1074_v0 = vmov 0   ;;  %vm175_vm0 = vcmask 130048   ;;  %v44_v1 = vld [vmem:[%s1337_s0 + $0x78] sm:$0xff]  ;;  %v43_v2 = vld [vmem:[%s1337_s0 + $0x70] sm:$0xff] }
   0xf   :  { %1021 = vset.pattern.permute.xlu0 %v1074_v0  ;;  %1022 = vset.pattern.permute.xlu1 %v1074_v0  ;;  %v42_v3 = vld [vmem:[%s1337_s0 + $0x68] sm:$0xff]  ;;  %v61_v4 = vld [vmem:[#allocation2 + $0x80] sm:$0xff]  ;;  %v1123_v6 = vld [vmem:[%s1339_s2 + $0x78] sm:$0xff]  ;;  %v1075_v50 = vmov 1  }
  0x10   :  { %867 = vmatprep.subr.msk.mxu0 %vm175_vm0, %v44_v1  ;;  %899 = vmatprep.mubr.msk.f32.mxu0 %vm175_vm0, %v61_v4  ;;  %v41_v5 = vld [vmem:[%s1337_s0 + $0x60] sm:$0xff]  ;;  %v1130_v7 = vld [vmem:[%s1339_s2 + $0x68] sm:$0xff]  ;;  %v40_v8 = vld [vmem:[%s1337_s0 + $0x58] sm:$0xff] }
  0x11   :  { %868 = vmatpush3.xpose.msk.msra.mxu0 %vm175_vm0, %v44_v1  ;;  %172 = vperm.xlu0 %1021, %v1123_v6   ;;  %v1139_v9 = vld [vmem:[%s1339_s2 + $0x70] sm:$0xff]  ;;  %v1144_v10 = vld [vmem:[%s1339_s2 + $0x60] sm:$0xff]  ;;  %v1156_v12 = vld [vmem:[%s1339_s2 + $0x58] sm:$0xff] }
  0x12   :  { %869 = vmatprep.subr.msk.mxu0 %vm175_vm0, %v43_v2  ;;  %162 = vperm.xlu1 %1022, %v1130_v7   ;;  %v39_v11 = vld [vmem:[%s1337_s0 + $0x50] sm:$0xff]  ;;  %v38_v14 = vld [vmem:[%s1337_s0 + $0x48] sm:$0xff]  ;;  %v1178_v16 = vld [vmem:[%s1339_s2 + $0x40] sm:$0xff] }
  0x13   :  { %v1161_v13 = vld [vmem:[%s1339_s2 + $0x50] sm:$0xff]  ;;  %v1173_v15 = vld [vmem:[%s1339_s2 + $0x48] sm:$0xff]  ;;  %v37_v17 = vld [vmem:[%s1337_s0 + $0x40] sm:$0xff] }
  0x14   :  { %v1190_v18 = vld [vmem:[%s1339_s2 + $0x38] sm:$0xff]  ;;  %v1195_v19 = vld [vmem:[%s1339_s2 + $0x30] sm:$0xff]  ;;  %v1207_v21 = vld [vmem:[%s1339_s2 + $0x28] sm:$0xff] }
  0x15   :  { %870 = vmatpush3.xpose.msk.msra.mxu0 %vm175_vm0, %v43_v2  ;;  %167 = vperm.xlu0 %1021, %v1139_v9   ;;  %v36_v20 = vld [vmem:[%s1337_s0 + $0x38] sm:$0xff]  ;;  %v1212_v22 = vld [vmem:[%s1339_s2 + $0x20] sm:$0xff]  ;;  %v35_v23 = vld [vmem:[%s1337_s0 + $0x30] sm:$0xff] }
  0x16   :  { %871 = vmatprep.subr.msk.mxu0 %vm175_vm0, %v42_v3  ;;  %157 = vperm.xlu1 %1022, %v1144_v10   ;;  %v1224_v24 = vld [vmem:[%s1339_s2 + $0x18] sm:$0xff]  ;;  %v1229_v25 = vld [vmem:[%s1339_s2 + $0x10] sm:$0xff]  ;;  %v34_v26 = vld [vmem:[%s1337_s0 + $0x28] sm:$0xff] }
  0x17   :  { %v1241_v27 = vld [vmem:[%s1339_s2 + $0x8] sm:$0xff]  ;;  %v1246_v28 = vld [vmem:[%s1339_s2] sm:$0xff]  ;;  %v32_v30 = vld [vmem:[%s1337_s0 + $0x18] sm:$0xff] }
  0x18   :  { %v33_v29 = vld [vmem:[%s1337_s0 + $0x20] sm:$0xff]  ;;  %v31_v31 = vld [vmem:[%s1337_s0 + $0x10] sm:$0xff]  ;;  %v30_v32 = vld [vmem:[%s1337_s0 + $0x8] sm:$0xff] }
  0x19   :  { %872 = vmatpush3.xpose.msk.msra.mxu0 %vm175_vm0, %v42_v3  ;;  %152 = vperm.xlu0 %1021, %v1156_v12   ;;  %v29_v33 = vld [vmem:[%s1337_s0] sm:$0xff]  ;;  %v62_v34 = vld [vmem:[#allocation2 + $0x88] sm:$0xff]  ;;  %v63_v35 = vld [vmem:[#allocation2 + $0x90] sm:$0xff]  ;;  %s1077_s0 = smov [#allocation5]  }
  0x1a   :  { %873 = vmatprep.subr.msk.mxu0 %vm175_vm0, %v41_v5  ;;  %147 = vperm.xlu1 %1022, %v1161_v13   ;;  %v64_v36 = vld [vmem:[#allocation2 + $0x98] sm:$0xff]  ;;  %v65_v37 = vld [vmem:[#allocation2 + $0xa0] sm:$0xff]  ;;  %v66_v38 = vld [vmem:[#allocation2 + $0xa8] sm:$0xff]  ;;  %s744_s25 = sshll.u32 %s1077_s0, 4  ;;  %s745_s25 = int_to_ptr.vmem [resolvable:$true] %s744_s25 }
  0x1b   :  { %v67_v39 = vld [vmem:[#allocation2 + $0xb0] sm:$0xff]  ;;  %v68_v40 = vld [vmem:[#allocation2 + $0xb8] sm:$0xff]  ;;  %v69_v41 = vld [vmem:[#allocation2 + $0xc0] sm:$0xff]  ;;  %s1047_s26 = scalar_lea.vmem %s745_s25, 16  ;;  %s1051_s27 = scalar_lea.vmem %s745_s25, 32 }
  0x1c   :  { %v70_v42 = vld [vmem:[#allocation2 + $0xc8] sm:$0xff]  ;;  %v71_v43 = vld [vmem:[#allocation2 + $0xd0] sm:$0xff]  ;;  %v72_v44 = vld [vmem:[#allocation2 + $0xd8] sm:$0xff]  ;;  %p1048_p5 = scmp.ne.s32.totalorder %s745_s25, %s1047_s26  ;;  %p1052_p6 = scmp.lt.s32.totalorder %s745_s25, %s745_s25 }
  0x1d   :  { %874 = vmatpush3.xpose.msk.msra.mxu0 %vm175_vm0, %v41_v5  ;;  %142 = vperm.xlu0 %1021, %v1173_v15   ;;  %v73_v45 = vld [vmem:[#allocation2 + $0xe0] sm:$0xff]  ;;  %v74_v46 = vld [vmem:[#allocation2 + $0xe8] sm:$0xff]  ;;  %v75_v47 = vld [vmem:[#allocation2 + $0xf0] sm:$0xff]  ;;  %p1053_p7 = scmp.lt.s32.totalorder %s1051_s27, %s1047_s26 }
  0x1e   :  { %875 = vmatprep.subr.msk.mxu0 %vm175_vm0, %v40_v8  ;;  %137 = vperm.xlu1 %1022, %v1178_v16   ;;  %v76_v48 = vld [vmem:[#allocation2 + $0xf8] sm:$0xff]  ;;  %v45_v49 = vld [vmem:[#allocation2] sm:$0xff] }
  0x1f   :  { %955 = vmatprep.mubr.f32.mxu1 %v45_v49  ;;  %p1054_p8 = por %p1053_p7, %p1052_p6 }
  0x21   :  { %876 = vmatpush3.xpose.msk.msra.mxu0 %vm175_vm0, %v40_v8  ;;  %132 = vperm.xlu0 %1021, %v1190_v18   ;;  %p1055_p9 = pnand %p1054_p8, %p1048_p5 }
  0x22   :  { %877 = vmatprep.subr.msk.mxu0 %vm175_vm0, %v39_v11  ;;  %127 = vperm.xlu1 %1022, %v1195_v19  }
  0x25   :  { %878 = vmatpush3.xpose.msk.msra.mxu0 %vm175_vm0, %v39_v11  ;;  %122 = vperm.xlu0 %1021, %v1207_v21  }
  0x26   :  { %879 = vmatprep.subr.msk.mxu0 %vm175_vm0, %v38_v14  ;;  %117 = vperm.xlu1 %1022, %v1212_v22  }
  0x29   :  { %880 = vmatpush3.xpose.msk.msra.mxu0 %vm175_vm0, %v38_v14  ;;  %112 = vperm.xlu0 %1021, %v1224_v24  }
  0x2a   :  { %881 = vmatprep.subr.msk.mxu0 %vm175_vm0, %v37_v17  ;;  %107 = vperm.xlu1 %1022, %v1229_v25  }
  0x2d   :  { %882 = vmatpush3.xpose.msk.msra.mxu0 %vm175_vm0, %v37_v17  ;;  %102 = vperm.xlu0 %1021, %v1241_v27  }
  0x2e   :  { %883 = vmatprep.subr.msk.mxu0 %vm175_vm0, %v36_v20  ;;  %97 = vperm.xlu1 %1022, %v1246_v28  }
  0x31   :  { %884 = vmatpush3.xpose.msk.msra.mxu0 %vm175_vm0, %v36_v20  ;;  %1023 = vset.pattern.permute.xlu0 %v1075_v50 }
  0x32   :  { %885 = vmatprep.subr.msk.mxu0 %vm175_vm0, %v35_v23  ;;  %1024 = vset.pattern.permute.xlu1 %v1075_v50 }
  0x33   :  { %490 = vperm.xlu1 %1024, %v1139_v9   ;;  %494 = vperm.xlu0 %1023, %v1123_v6  }
  0x35   :  { %886 = vmatpush3.xpose.msk.msra.mxu0 %vm175_vm0, %v35_v23 }
  0x36   :  { %887 = vmatprep.subr.msk.mxu0 %vm175_vm0, %v34_v26 }
  0x37   :  { %486 = vperm.xlu1 %1024, %v1130_v7   ;;  %482 = vperm.xlu0 %1023, %v1144_v10  }
  0x39   :  { %888 = vmatpush3.xpose.msk.msra.mxu0 %vm175_vm0, %v34_v26 }
  0x3a   :  { %889 = vmatprep.subr.msk.mxu0 %vm175_vm0, %v33_v29 }
  0x3b   :  { %478 = vperm.xlu1 %1024, %v1156_v12   ;;  %474 = vperm.xlu0 %1023, %v1161_v13  }
  0x3d   :  { %890 = vmatpush3.xpose.msk.msra.mxu0 %vm175_vm0, %v33_v29 }
  0x3e   :  { %891 = vmatprep.subr.msk.mxu0 %vm175_vm0, %v32_v30 }
  0x3f   :  { %470 = vperm.xlu1 %1024, %v1173_v15   ;;  %466 = vperm.xlu0 %1023, %v1178_v16  }
  0x41   :  { %892 = vmatpush3.xpose.msk.msra.mxu0 %vm175_vm0, %v32_v30 }
  0x42   :  { %893 = vmatprep.subr.msk.mxu0 %vm175_vm0, %v31_v31 }
  0x43   :  { %462 = vperm.xlu1 %1024, %v1190_v18   ;;  %458 = vperm.xlu0 %1023, %v1195_v19  }
  0x45   :  { %894 = vmatpush3.xpose.msk.msra.mxu0 %vm175_vm0, %v31_v31 }
  0x46   :  { %895 = vmatprep.subr.msk.mxu0 %vm175_vm0, %v30_v32 }
  0x47   :  { %454 = vperm.xlu1 %1024, %v1207_v21   ;;  %450 = vperm.xlu0 %1023, %v1212_v22  }
  0x49   :  { %896 = vmatpush3.xpose.msk.msra.mxu0 %vm175_vm0, %v30_v32 }
  0x4a   :  { %897 = vmatprep.subr.msk.mxu0 %vm175_vm0, %v29_v33 }
  0x4b   :  { %446 = vperm.xlu1 %1024, %v1224_v24   ;;  %442 = vperm.xlu0 %1023, %v1229_v25  }
  0x4d   :  { %898 = vmatpush3.xpose.msk.msra.mxu0 %vm175_vm0, %v29_v33 }
  0x4f   :  { %438 = vperm.xlu1 %1024, %v1241_v27   ;;  %434 = vperm.xlu0 %1023, %v1246_v28  }
  0x50   :  { %900 = vmatmul.mubr.msk.f32.vlgmr.msra.gmra.mxu0 %vm175_vm0, %v62_v34 }
  0x51   :  { %902 = vmatprep.mubr.msk.f32.mxu0 %vm175_vm0, %v63_v35 }
  0x54   :  { %903 = vmatmul.mubr.msk.f32.gmra.mxu0 %vm175_vm0, %v64_v36 }
  0x55   :  { %905 = vmatprep.mubr.msk.f32.mxu0 %vm175_vm0, %v65_v37 }
  0x58   :  { %906 = vmatmul.mubr.msk.f32.gmra.mxu0 %vm175_vm0, %v66_v38 }
  0x59   :  { %908 = vmatprep.mubr.msk.f32.mxu0 %vm175_vm0, %v67_v39 }
  0x5c   :  { %909 = vmatmul.mubr.msk.f32.gmra.mxu0 %vm175_vm0, %v68_v40 }
  0x5d   :  { %911 = vmatprep.mubr.msk.f32.mxu0 %vm175_vm0, %v69_v41 }
  0x60   :  { %912 = vmatmul.mubr.msk.f32.gmra.mxu0 %vm175_vm0, %v70_v42 }
  0x61   :  { %914 = vmatprep.mubr.msk.f32.mxu0 %vm175_vm0, %v71_v43 }
  0x64   :  { %915 = vmatmul.mubr.msk.f32.gmra.mxu0 %vm175_vm0, %v72_v44 }
  0x65   :  { %917 = vmatprep.mubr.msk.f32.mxu0 %vm175_vm0, %v73_v45 }
  0x68   :  { %918 = vmatmul.mubr.msk.f32.gmra.mxu0 %vm175_vm0, %v74_v46 }
  0x69   :  { %920 = vmatprep.mubr.msk.f32.mxu0 %vm175_vm0, %v75_v47 }
  0x6c   :  { %921 = vmatmul.mubr.msk.f32.gmra.mxu0 %vm175_vm0, %v76_v48 }
  0x8c   :  { %v173_v56 = vpop.permute.xlu0 %172 }
  0x8d   :  { %v163_v58 = vpop.permute.xlu1 %162 }
  0x90   :  { %v168_v61 = vpop.permute.xlu0 %167 }
  0x91   :  { %v158_v63 = vpop.permute.xlu1 %157 }
  0x94   :  { %v153_v2 = vpop.permute.xlu0 %152 }
  0x95   :  { %v148_v4 = vpop.permute.xlu1 %147 }
  0x98   :  { %v143_v7 = vpop.permute.xlu0 %142 }
  0x99   :  { %v138_v10 = vpop.permute.xlu1 %137 }
  0x9c   :  { %v133_v17 = vpop.permute.xlu0 %132 }
  0x9d   :  { %v128_v20 = vpop.permute.xlu1 %127 }
  0xa0   :  { %v123_v25 = vpop.permute.xlu0 %122 }
  0xa1   :  { %v118_v29 = vpop.permute.xlu1 %117 }
  0xa4   :  { %v113_v34 = vpop.permute.xlu0 %112 }
  0xa5   :  { %v108_v37 = vpop.permute.xlu1 %107 }
  0xa8   :  { %v103_v42 = vpop.permute.xlu0 %102 }
  0xa9   :  { %v98_v45 = vpop.permute.xlu1 %97 }
 0x110   :  { %v1309_v51 = vpop.f32.mrf.mxu0 }
 0x111   :  { %v344_v46 = vadd.f32 %v1309_v51, %v103_v42  ;;  %v48_v51 = vld [vmem:[#allocation2 + $0x18] sm:$0xff] }
 0x112   :  { %v1311_v52 = vpop.f32.mrf.mxu0 }
 0x113   :  { %v339_v48 = vadd.f32 %v1311_v52, %v98_v45  ;;  %v418_v50 = vmax.f32 %v344_v46, 0.0  ;;  %v50_v52 = vld [vmem:[#allocation2 + $0x28] sm:$0xff] }
 0x114   :  { %v1313_v53 = vpop.f32.mrf.mxu0 }
 0x115   :  { %v354_v40 = vadd.f32 %v1313_v53, %v113_v34  ;;  %v417_v53 = vmax.f32 %v339_v48, 0.0 }
 0x116   :  { %v1315_v54 = vpop.f32.mrf.mxu0 }
 0x117   :  { %v349_v43 = vadd.f32 %v1315_v54, %v108_v37  ;;  %v420_v47 = vmax.f32 %v354_v40, 0.0  ;;  %v46_v54 = vld [vmem:[#allocation2 + $0x8] sm:$0xff] }
 0x118   :  { %v907_v55 = vpop.f32.mrf.mxu0 }
 0x119   :  { %v364_v35 = vadd.f32 %v907_v55, %v123_v25  ;;  %v419_v49 = vmax.f32 %v349_v43, 0.0  ;;  %v47_v55 = vld [vmem:[#allocation2 + $0x10] sm:$0xff] }
 0x11a   :  { %v358_v57 = vpop.f32.mrf.mxu0 }
 0x11b   :  { %v359_v38 = vadd.f32 %v358_v57, %v118_v29  ;;  %v422_v41 = vmax.f32 %v364_v35, 0.0  ;;  %v51_v57 = vld [vmem:[#allocation2 + $0x30] sm:$0xff] }
 0x11c   :  { %v910_v59 = vpop.f32.mrf.mxu0 }
 0x11d   :  { %v374_v30 = vadd.f32 %v910_v59, %v133_v17  ;;  %v421_v44 = vmax.f32 %v359_v38, 0.0  ;;  %v53_v59 = vld [vmem:[#allocation2 + $0x40] sm:$0xff] }
 0x11e   :  { %v368_v60 = vpop.f32.mrf.mxu0 }
 0x11f   :  { %v369_v32 = vadd.f32 %v368_v60, %v128_v20  ;;  %v424_v36 = vmax.f32 %v374_v30, 0.0  ;;  %v54_v60 = vld [vmem:[#allocation2 + $0x48] sm:$0xff] }
 0x120   :  { %v913_v62 = vpop.f32.mrf.mxu0 }
 0x121   :  { %v384_v23 = vadd.f32 %v913_v62, %v143_v7  ;;  %v423_v39 = vmax.f32 %v369_v32, 0.0  ;;  %v56_v62 = vld [vmem:[#allocation2 + $0x58] sm:$0xff] }
 0x122   :  { %v378_v0 = vpop.f32.mrf.mxu0 }
 0x123   :  { %v379_v26 = vadd.f32 %v378_v0, %v138_v10  ;;  %v426_v31 = vmax.f32 %v384_v23, 0.0  ;;  %v58_v0 = vld [vmem:[#allocation2 + $0x68] sm:$0xff]  ;;  %v491_v10 = vpop.permute.xlu1 %490 }
 0x124   :  { %v916_v1 = vpop.f32.mrf.mxu0 }
 0x125   :  { %v394_v18 = vadd.f32 %v916_v1, %v153_v2  ;;  %v425_v33 = vmax.f32 %v379_v26, 0.0  ;;  %v59_v1 = vld [vmem:[#allocation2 + $0x70] sm:$0xff]  ;;  %v60_v2 = vld [vmem:[#allocation2 + $0x78] sm:$0xff] }
 0x126   :  { %v388_v3 = vpop.f32.mrf.mxu0 }
 0x127   :  { %v389_v21 = vadd.f32 %v388_v3, %v148_v4  ;;  %v428_v24 = vmax.f32 %v394_v18, 0.0  ;;  %v77_v3 = vld [vmem:[#allocation2 + $0x100] sm:$0xff]  ;;  %v1076_v4 = vmov 2  }
 0x128   :  { %v919_v5 = vpop.f32.mrf.mxu0  ;;  %1025 = vset.pattern.permute.xlu1 %v1076_v4  ;;  %1026 = vset.pattern.permute.xlu0 %v1076_v4 }
 0x129   :  { %v404_v12 = vadd.f32 %v919_v5, %v163_v58  ;;  %v427_v27 = vmax.f32 %v389_v21, 0.0  ;;  %v52_v58 = vld [vmem:[#allocation2 + $0x38] sm:$0xff]  ;;  %733 = vperm.xlu1 %1025, %v1246_v28  }
 0x12a   :  { %v398_v6 = vpop.f32.mrf.mxu0 }
 0x12b   :  { %v399_v15 = vadd.f32 %v398_v6, %v158_v63  ;;  %v430_v19 = vmax.f32 %v404_v12, 0.0  ;;  %v57_v63 = vld [vmem:[#allocation2 + $0x60] sm:$0xff]  ;;  %v495_v12 = vpop.permute.xlu0 %494 }
 0x12c   :  { %v922_v8 = vpop.f32.mrf.mxu0 }
 0x12d   :  { %v414_v9 = vadd.f32 %v922_v8, %v173_v56  ;;  %v429_v22 = vmax.f32 %v399_v15, 0.0  ;;  %v49_v56 = vld [vmem:[#allocation2 + $0x20] sm:$0xff]  ;;  %v487_v15 = vpop.permute.xlu1 %486 }
 0x12e   :  { %v408_v11 = vpop.f32.mrf.mxu0 }
 0x12f   :  { %v432_v13 = vmax.f32 %v414_v9, 0.0  ;;  %v409_v14 = vadd.f32 %v408_v11, %v168_v61  ;;  %v55_v61 = vld [vmem:[#allocation2 + $0x50] sm:$0xff]  ;;  %v483_v17 = vpop.permute.xlu0 %482 }
 0x131   :  { %v431_v16 = vmax.f32 %v409_v14, 0.0  ;;  %923 = vmatprep.subr.mxu1 %v432_v13  ;;  %v479_v28 = vpop.permute.xlu1 %478 }
 0x132   :  { %924 = vmatpush3.msra.mxu1 %v432_v13 }
 0x133   :  { %925 = vmatprep.subr.mxu1 %v431_v16  ;;  %v475_v21 = vpop.permute.xlu0 %474 }
 0x134   :  { %926 = vmatpush3.msra.mxu1 %v431_v16 }
 0x135   :  { %927 = vmatprep.subr.mxu1 %v430_v19 }
 0x136   :  { %928 = vmatpush3.msra.mxu1 %v430_v19 }
 0x137   :  { %929 = vmatprep.subr.mxu1 %v429_v22 }
 0x138   :  { %930 = vmatpush3.msra.mxu1 %v429_v22 }
 0x139   :  { %931 = vmatprep.subr.mxu1 %v428_v24 }
 0x13a   :  { %932 = vmatpush3.msra.mxu1 %v428_v24  ;;  %v471_v24 = vpop.permute.xlu1 %470 }
 0x13b   :  { %933 = vmatprep.subr.mxu1 %v427_v27 }
 0x13c   :  { %934 = vmatpush3.msra.mxu1 %v427_v27  ;;  %v467_v27 = vpop.permute.xlu0 %466 }
 0x13d   :  { %935 = vmatprep.subr.mxu1 %v426_v31 }
 0x13e   :  { %936 = vmatpush3.msra.mxu1 %v426_v31  ;;  %v463_v35 = vpop.permute.xlu1 %462 }
 0x13f   :  { %937 = vmatprep.subr.mxu1 %v425_v33 }
 0x140   :  { %938 = vmatpush3.msra.mxu1 %v425_v33  ;;  %v459_v38 = vpop.permute.xlu0 %458 }
 0x141   :  { %939 = vmatprep.subr.mxu1 %v424_v36 }
 0x142   :  { %940 = vmatpush3.msra.mxu1 %v424_v36  ;;  %v455_v43 = vpop.permute.xlu1 %454 }
 0x143   :  { %941 = vmatprep.subr.mxu1 %v423_v39 }
 0x144   :  { %942 = vmatpush3.msra.mxu1 %v423_v39  ;;  %v451_v46 = vpop.permute.xlu0 %450 }
 0x145   :  { %943 = vmatprep.subr.mxu1 %v422_v41 }
 0x146   :  { %944 = vmatpush3.msra.mxu1 %v422_v41 }
 0x147   :  { %945 = vmatprep.subr.mxu1 %v421_v44 }
 0x148   :  { %946 = vmatpush3.msra.mxu1 %v421_v44 }
 0x149   :  { %947 = vmatprep.subr.mxu1 %v420_v47 }
 0x14a   :  { %948 = vmatpush3.msra.mxu1 %v420_v47 }
 0x14b   :  { %949 = vmatprep.subr.mxu1 %v419_v49 }
 0x14c   :  { %950 = vmatpush3.msra.mxu1 %v419_v49 }
 0x14d   :  { %951 = vmatprep.subr.mxu1 %v418_v50 }
 0x14e   :  { %952 = vmatpush3.msra.mxu1 %v418_v50 }
 0x14f   :  { %953 = vmatprep.subr.mxu1 %v417_v53 }
 0x150   :  { %954 = vmatpush3.msra.mxu1 %v417_v53  ;;  %v447_v53 = vpop.permute.xlu1 %446 }
 0x151   :  { %956 = vmatmul.mubr.f32.vlgmr.msra.gmra.mxu1 %v46_v54 }
 0x152   :  { %958 = vmatprep.mubr.f32.mxu1 %v47_v55 }
 0x155   :  { %959 = vmatmul.mubr.f32.gmra.mxu1 %v48_v51  ;;  %v443_v51 = vpop.permute.xlu0 %442 }
 0x156   :  { %961 = vmatprep.mubr.f32.mxu1 %v49_v56 }
 0x159   :  { %962 = vmatmul.mubr.f32.gmra.mxu1 %v50_v52 }
 0x15a   :  { %964 = vmatprep.mubr.f32.mxu1 %v51_v57 }
 0x15d   :  { %965 = vmatmul.mubr.f32.gmra.mxu1 %v52_v58 }
 0x15e   :  { %967 = vmatprep.mubr.f32.mxu1 %v53_v59  ;;  %v439_v59 = vpop.permute.xlu1 %438 }
 0x161   :  { %968 = vmatmul.mubr.f32.gmra.mxu1 %v54_v60 }
 0x162   :  { %970 = vmatprep.mubr.f32.mxu1 %v55_v61 }
 0x165   :  { %971 = vmatmul.mubr.f32.gmra.mxu1 %v56_v62  ;;  %v435_v62 = vpop.permute.xlu0 %434 }
 0x166   :  { %973 = vmatprep.mubr.f32.mxu1 %v57_v63 }
 0x169   :  { %974 = vmatmul.mubr.f32.gmra.mxu1 %v58_v0 }
 0x16a   :  { %976 = vmatprep.mubr.f32.mxu1 %v59_v1 }
 0x16d   :  { %977 = vmatmul.mubr.f32.gmra.mxu1 %v60_v2 }
 0x16e   :  { %1011 = vmatprep.mubr.f32.mxu1 %v77_v3 }
 0x211   :  { %v1322_v5 = vpop.f32.mrf.mxu1 }
 0x212   :  { %v569_v63 = vadd.f32 %v1322_v5, %v439_v59  ;;  %v734_v5 = vpop.permute.xlu1 %733 }
 0x213   :  { %v1324_v6 = vpop.f32.mrf.mxu1 }
 0x214   :  { %v564_v1 = vadd.f32 %v1324_v6, %v435_v62  ;;  %v643_v3 = vmax.f32 %v569_v63, 0.0 }
 0x215   :  { %v1326_v7 = vpop.f32.mrf.mxu1 }
 0x216   :  { %v579_v57 = vadd.f32 %v1326_v7, %v447_v53  ;;  %v642_v4 = vmax.f32 %v564_v1, 0.0  ;;  %v78_v7 = vld [vmem:[#allocation2 + $0x108] sm:$0xff] }
 0x217   :  { %v1328_v8 = vpop.f32.mrf.mxu1 }
 0x218   :  { %v574_v60 = vadd.f32 %v1328_v8, %v443_v51  ;;  %v645_v0 = vmax.f32 %v579_v57, 0.0 }
 0x219   :  { %v963_v9 = vpop.f32.mrf.mxu1 }
 0x21a   :  { %v589_v54 = vadd.f32 %v963_v9, %v455_v43  ;;  %v644_v2 = vmax.f32 %v574_v60, 0.0 }
 0x21b   :  { %v583_v11 = vpop.f32.mrf.mxu1 }
 0x21c   :  { %v584_v56 = vadd.f32 %v583_v11, %v451_v46  ;;  %v647_v58 = vmax.f32 %v589_v54, 0.0 }
 0x21d   :  { %v966_v13 = vpop.f32.mrf.mxu1 }
 0x21e   :  { %v599_v47 = vadd.f32 %v966_v13, %v463_v35  ;;  %v646_v61 = vmax.f32 %v584_v56, 0.0 }
 0x21f   :  { %v593_v14 = vpop.f32.mrf.mxu1 }
 0x220   :  { %v594_v49 = vadd.f32 %v593_v14, %v459_v38  ;;  %v649_v55 = vmax.f32 %v599_v47, 0.0 }
 0x221   :  { %v969_v16 = vpop.f32.mrf.mxu1 }
 0x222   :  { %v609_v41 = vadd.f32 %v969_v16, %v471_v24  ;;  %v648_v52 = vmax.f32 %v594_v49, 0.0 }
 0x223   :  { %v603_v18 = vpop.f32.mrf.mxu1 }
 0x224   :  { %v604_v44 = vadd.f32 %v603_v18, %v467_v27  ;;  %v651_v48 = vmax.f32 %v609_v41, 0.0 }
 0x225   :  { %v972_v19 = vpop.f32.mrf.mxu1 }
 0x226   :  { %v619_v36 = vadd.f32 %v972_v19, %v479_v28  ;;  %v650_v50 = vmax.f32 %v604_v44, 0.0 }
 0x227   :  { %v613_v20 = vpop.f32.mrf.mxu1 }
 0x228   :  { %v614_v39 = vadd.f32 %v613_v20, %v475_v21  ;;  %v653_v42 = vmax.f32 %v619_v36, 0.0 }
 0x229   :  { %v975_v22 = vpop.f32.mrf.mxu1 }
 0x22a   :  { %v629_v30 = vadd.f32 %v975_v22, %v487_v15  ;;  %v652_v45 = vmax.f32 %v614_v39, 0.0 }
 0x22b   :  { %v623_v23 = vpop.f32.mrf.mxu1 }
 0x22c   :  { %v624_v33 = vadd.f32 %v623_v23, %v483_v17  ;;  %v655_v37 = vmax.f32 %v629_v30, 0.0 }
 0x22d   :  { %v978_v25 = vpop.f32.mrf.mxu1 }
 0x22e   :  { %v639_v26 = vadd.f32 %v978_v25, %v495_v12  ;;  %v654_v40 = vmax.f32 %v624_v33, 0.0 }
 0x22f   :  { %v633_v29 = vpop.f32.mrf.mxu1 }
 0x230   :  { %v657_v31 = vmax.f32 %v639_v26, 0.0  ;;  %v634_v32 = vadd.f32 %v633_v29, %v491_v10 }
 0x232   :  { %v656_v34 = vmax.f32 %v634_v32, 0.0  ;;  %979 = vmatprep.subr.mxu1 %v657_v31 }
 0x233   :  { %980 = vmatpush3.msra.mxu1 %v657_v31 }
 0x234   :  { %981 = vmatprep.subr.mxu1 %v656_v34 }
 0x235   :  { %982 = vmatpush3.msra.mxu1 %v656_v34 }
 0x236   :  { %983 = vmatprep.subr.mxu1 %v655_v37 }
 0x237   :  { %984 = vmatpush3.msra.mxu1 %v655_v37 }
 0x238   :  { %985 = vmatprep.subr.mxu1 %v654_v40 }
 0x239   :  { %986 = vmatpush3.msra.mxu1 %v654_v40 }
 0x23a   :  { %987 = vmatprep.subr.mxu1 %v653_v42 }
 0x23b   :  { %988 = vmatpush3.msra.mxu1 %v653_v42 }
 0x23c   :  { %989 = vmatprep.subr.mxu1 %v652_v45 }
 0x23d   :  { %990 = vmatpush3.msra.mxu1 %v652_v45 }
 0x23e   :  { %991 = vmatprep.subr.mxu1 %v651_v48 }
 0x23f   :  { %992 = vmatpush3.msra.mxu1 %v651_v48 }
 0x240   :  { %993 = vmatprep.subr.mxu1 %v650_v50 }
 0x241   :  { %994 = vmatpush3.msra.mxu1 %v650_v50 }
 0x242   :  { %995 = vmatprep.subr.mxu1 %v649_v55 }
 0x243   :  { %996 = vmatpush3.msra.mxu1 %v649_v55 }
 0x244   :  { %997 = vmatprep.subr.mxu1 %v648_v52 }
 0x245   :  { %998 = vmatpush3.msra.mxu1 %v648_v52 }
 0x246   :  { %999 = vmatprep.subr.mxu1 %v647_v58 }
 0x247   :  { %1000 = vmatpush3.msra.mxu1 %v647_v58 }
 0x248   :  { %1001 = vmatprep.subr.mxu1 %v646_v61 }
 0x249   :  { %1002 = vmatpush3.msra.mxu1 %v646_v61 }
 0x24a   :  { %1003 = vmatprep.subr.mxu1 %v645_v0 }
 0x24b   :  { %1004 = vmatpush3.msra.mxu1 %v645_v0 }
 0x24c   :  { %1005 = vmatprep.subr.mxu1 %v644_v2 }
 0x24d   :  { %1006 = vmatpush3.msra.mxu1 %v644_v2 }
 0x24e   :  { %1007 = vmatprep.subr.mxu1 %v643_v3 }
 0x24f   :  { %1008 = vmatpush3.msra.mxu1 %v643_v3 }
 0x250   :  { %1009 = vmatprep.subr.mxu1 %v642_v4 }
 0x251   :  { %1010 = vmatpush3.msra.mxu1 %v642_v4 }
 0x252   :  { %1012 = vmatmul.mubr.f32.vlgmr.msra.gmra.mxu1 %v78_v7 }
 0x312   :  { %v1013_v8 = vpop.f32.mrf.mxu1 }
 0x314   :  { %v724_v9 = vpop.f32.mrf.mxu1 }
 0x315   :  { %v736_v10 = vadd.f32 %v734_v5, %v724_v9 }
 0x317   :  { %737 = vst [vmem:[#allocation5] sm:$0x1] %v736_v10 }
 0x318   :  { %1058 = shalt.err (!%p1055_p9)
}
 0x319   :  { %747 = dma.vmem_to_hbm [thread:$0]  %s745_s25, 16, %s1340_s3, [#allocation4]  }
 0x31a   :  { %1069 = dma.done.wait [#allocation4], 16  }
 0x31b   :  { %1070 = vsyncadd [#allocation4], 4294967280 }
 0x31c   :  { %751 = vsyncpa [#allocation3], 1 }
 0x31d   :  { %752 = vsyncpa [#allocation4], 1 }

</bundles_post_ra>
